<compile_context>
chip_gen: v6e
topology: v6e:2x2x1
jax: 0.10.0
libtpu: 0.0.40
codegen_flags: <defaults>
</compile_context>

<pallas_src>
import functools

import numpy as np
import jax
import jax.numpy as jnp
from jax.experimental import pallas as pl
from jax.experimental.pallas import tpu as pltpu


# ----------------------------- small helpers --------------------------------
def _round_up(a, b):
    return -(-a // b) * b


def _elu(z):
    # nn.ELU(alpha=1.0); clamp before exp so the dead branch never overflows.
    return jnp.where(z > 0, z, jnp.exp(jnp.minimum(z, 0.0)) - 1.0)


def _bytes_per_lane(dims):
    """Rough f32 VMEM bytes needed per batch-lane of one tile (double-buffered
    x/out blocks + a generous allowance for in-kernel temporaries)."""
    D_, H_, _ = dims
    H2 = 2 * H_
    return 4 * (2 * _round_up(D_, 8)          # x block, double-buffered
                + 2 * _round_up(D_ + 1, 8)    # out block, double-buffered
                + 8 * (H2 + D_))              # live temporaries allowance


def _default_tb(batch, dims):
    """Largest lane-tile (multiple of 128) that fits the per-generation VMEM
    budget, while keeping >=2 grid steps when the batch allows (v7x: 2 TCs)."""
    try:
        phys = int(getattr(pltpu.get_tpu_info(), "vmem_capacity_bytes", 64 << 20))
    except Exception:  # not on TPU / API unavailable
        phys = 64 << 20
    budget = min(phys // 2, 32 << 20)
    tb_max = max(128, min(8192, (budget // _bytes_per_lane(dims)) // 128 * 128))
    b128 = _round_up(max(int(batch), 1), 128)
    if b128 >= 256:
        tb = min(tb_max, _round_up(-(-b128 // 2), 128))   # >= 2 balanced steps
    else:
        tb = min(tb_max, b128)
    return tb


def _vmem_limit(tb, dims, weight_bytes):
    est = _bytes_per_lane(dims) * tb + 4 * weight_bytes + (2 << 20)
    return int(min(40 << 20, max(2 * est, 16 << 20)))


# ----------------------------- Pallas kernel --------------------------------
def _made_pair_t(x_mxu, w_ref, b_ref, *, D_, H2, NH1_, mxu_dtype):
    """One fused (mu, logstd) MADE pair, batch-on-lanes (features x batch).

    Weight slab layout (rows; all sub-blocks start at column 0):
      [0, H2)                  fused input layer        cols [0, D)
      [H2 + l*H2, H2+(l+1)*H2) fused hidden layer l     cols [0, H2)   (block-diag)
      [ro, ro+2D)              fused output-from-hidden cols [0, H2)   (0.5 folded)
      [ro+2D, ro+4D)           fused direct connect     cols [0, D)    (0.5 folded)
    with ro = H2*(1+NH1).  Bias slab is (rows, 1), f32, same row layout.
    """
    h = _elu(jnp.dot(w_ref[0:H2, 0:D_], x_mxu,
                     preferred_element_type=jnp.float32) + b_ref[0:H2, :])
    for l in range(NH1_):                                # static unroll
        r0 = H2 + l * H2
        h = _elu(jnp.dot(w_ref[r0:r0 + H2, 0:H2], h.astype(mxu_dtype),
                         preferred_element_type=jnp.float32) + b_ref[r0:r0 + H2, :])
    ro = H2 * (1 + NH1_)
    rd = ro + 2 * D_
    out = (jnp.dot(w_ref[ro:rd, 0:H2], h.astype(mxu_dtype),
                   preferred_element_type=jnp.float32)
           + jnp.dot(w_ref[rd:rd + 2 * D_, 0:D_], x_mxu,
                     preferred_element_type=jnp.float32)
           + b_ref[ro:rd, :])                            # (2D, TB) f32
    return out[0:D_, :], out[D_:2 * D_, :]               # mu, logstd


def dual_block_kernel(x_ref, wf_ref, bf_ref, wb_ref, bb_ref, out_ref,
                      *, dims, mxu_dtype):
    D_, H_, NH1_ = dims
    H2 = 2 * H_
    xT = x_ref[...]                                      # (D, TB) f32
    x_m = xT.astype(mxu_dtype)

    # forward IAF block (MADE order 'A')
    mu_f, logstd_f = _made_pair_t(x_m, wf_ref, bf_ref, D_=D_, H2=H2,
                                  NH1_=NH1_, mxu_dtype=mxu_dtype)
    x1 = mu_f + xT * jnp.exp(logstd_f)                   # f32 elementwise (EUP/VPU)

    # backward IAF block (MADE order 'B')
    mu_b, logstd_b = _made_pair_t(x1.astype(mxu_dtype), wb_ref, bb_ref, D_=D_,
                                  H2=H2, NH1_=NH1_, mxu_dtype=mxu_dtype)
    y = mu_b + x1 * jnp.exp(logstd_b)

    logdet = -jnp.sum(logstd_f + logstd_b, axis=0, keepdims=True)   # (1, TB)

    # Both stores are fully lane-dense (128-wide) in this layout; the old
    # lane-masked partial-store problem is gone.
    out_ref[0:D_, :] = y
    out_ref[D_:, :] = logdet


def iaf_made_dual_block(x, packed, *, tb=None):
    """x: (B, D) float32.  packed: dict from pack_params.  Returns (y, logdet)."""
    D_, H_, NH1_ = packed['dims']
    mxu_dtype = packed['mxu_dtype']
    B, d_in = x.shape
    assert d_in == D_, f"x feature dim {d_in} != packed input_size {D_}"

    if tb is None:
        tb = _default_tb(B, packed['dims'])
    tb = max(128, _round_up(int(tb), 128))
    b_pad = _round_up(B, tb)
    grid = b_pad // tb

    # batch-on-lanes: features on sublanes, batch on the 128-wide lane axis.
    xT = jnp.transpose(x.astype(jnp.float32))            # (D, B) layout plumbing
    if b_pad != B:
        xT = jnp.pad(xT, ((0, 0), (0, b_pad - B)))       # zero tail, sliced off below

    slabs = (packed['w_f'], packed['b_f'], packed['w_b'], packed['b_b'])
    weight_bytes = sum(int(np.prod(a.shape)) * a.dtype.itemsize for a in slabs)

    kernel = functools.partial(dual_block_kernel, dims=packed['dims'],
                               mxu_dtype=mxu_dtype)
    out = pl.pallas_call(
        kernel,
        grid=(grid,),
        in_specs=[pl.BlockSpec((D_, tb), lambda i: (0, i))]
                 + [pl.BlockSpec(a.shape, lambda i: (0, 0)) for a in slabs],
        out_specs=pl.BlockSpec((D_ + 1, tb), lambda i: (0, i)),
        out_shape=jax.ShapeDtypeStruct((D_ + 1, b_pad), jnp.float32),
        compiler_params=pltpu.CompilerParams(
            dimension_semantics=("parallel",),            # shards batch on v7x's 2 TCs
            vmem_limit_bytes=_vmem_limit(tb, packed['dims'], weight_bytes)),
    )(xT, *slabs)

    y = jnp.transpose(out[:D_, :B])
    logdet = out[D_, :B]
    return y, logdet


# ----------------------------- parameter setup -------------------------------
def build_masks(D_, H_, order):
    """Standard MADE masks, sequential degrees, PyTorch (out, in) layout."""
    m_in = np.arange(1, D_ + 1) if order == 'A' else np.arange(D_, 0, -1)
    tu = max(D_ - 1, 1)
    m_hid = (np.arange(H_) % tu) + 1
    mask_ih = (m_hid[:, None] >= m_in[None, :]).astype(np.float32)   # (H, D)
    mask_hh = (m_hid[:, None] >= m_hid[None, :]).astype(np.float32)  # (H, H)
    mask_ho = (m_in[:, None] > m_hid[None, :]).astype(np.float32)    # (D, H)
    mask_io = (m_in[:, None] > m_in[None, :]).astype(np.float32)     # (D, D)
    return mask_ih, mask_hh, mask_ho, mask_io


def init_made_raw(key, D_, H_, NH_, order):
    """Masked params of one MADE in PyTorch (out, in) layout (F.linear form)."""
    NH1_ = NH_ - 1
    mask_ih, mask_hh, mask_ho, mask_io = build_masks(D_, H_, order)
    ks = jax.random.split(key, 6 + 2 * NH1_)

    def lin(k, out_f, in_f):
        b = 1.0 / np.sqrt(in_f)
        return jax.random.uniform(k, (out_f, in_f), jnp.float32, -b, b)

    def vec(k, out_f, in_f):
        b = 1.0 / np.sqrt(in_f)
        return jax.random.uniform(k, (out_f,), jnp.float32, -b, b)

    return dict(
        wi=lin(ks[0], H_, D_) * mask_ih, bi=vec(ks[1], H_, D_),
        wh=[lin(ks[2 + 2 * l], H_, H_) * mask_hh for l in range(NH1_)],
        bh=[vec(ks[3 + 2 * l], H_, H_) for l in range(NH1_)],
        wo=lin(ks[2 + 2 * NH1_], D_, H_) * mask_ho,
        bo=vec(ks[3 + 2 * NH1_], D_, H_),
        wd=lin(ks[4 + 2 * NH1_], D_, D_) * mask_io,
    )


def pack_block(p_mu, p_lv, D_, H_, NH1_, mxu_dtype):
    """Fuse one IAF block's (mu, logvar) MADE pair into ONE weight slab and
    ONE bias slab (left-multiply layout, 0.5 on logstd folded in)."""
    H2 = 2 * H_
    CW = max(H2, D_)
    R = H2 * (1 + NH1_) + 4 * D_
    w = np.zeros((R, CW), np.float32)
    b = np.zeros((R, 1), np.float32)
    # fused input layer
    w[0:H_, 0:D_] = np.asarray(p_mu['wi']); w[H_:H2, 0:D_] = np.asarray(p_lv['wi'])
    b[0:H_, 0] = np.asarray(p_mu['bi']);    b[H_:H2, 0] = np.asarray(p_lv['bi'])
    # fused hidden layers (block-diagonal)
    for l in range(NH1_):
        r0 = H2 + l * H2
        w[r0:r0 + H_, 0:H_] = np.asarray(p_mu['wh'][l])
        w[r0 + H_:r0 + H2, H_:H2] = np.asarray(p_lv['wh'][l])
        b[r0:r0 + H_, 0] = np.asarray(p_mu['bh'][l])
        b[r0 + H_:r0 + H2, 0] = np.asarray(p_lv['bh'][l])
    # fused output layer (0.5 on the logstd half folded in)
    ro = H2 * (1 + NH1_)
    w[ro:ro + D_, 0:H_] = np.asarray(p_mu['wo'])
    w[ro + D_:ro + 2 * D_, H_:H2] = 0.5 * np.asarray(p_lv['wo'])
    b[ro:ro + D_, 0] = np.asarray(p_mu['bo'])
    b[ro + D_:ro + 2 * D_, 0] = 0.5 * np.asarray(p_lv['bo'])
    # fused direct connect (x -> out), 0.5 folded into the logstd half
    rd = ro + 2 * D_
    w[rd:rd + D_, 0:D_] = np.asarray(p_mu['wd'])
    w[rd + D_:rd + 2 * D_, 0:D_] = 0.5 * np.asarray(p_lv['wd'])
    return jnp.asarray(w, mxu_dtype), jnp.asarray(b, jnp.float32)


def pack_params(raw, D_, H_, NH_, mxu_dtype=jnp.bfloat16):
    """raw = (mu_fwd, logvar_fwd, mu_bwd, logvar_bwd) dicts -> 4 slabs + dims."""
    NH1_ = NH_ - 1
    w_f, b_f = pack_block(raw[0], raw[1], D_, H_, NH1_, mxu_dtype)
    w_b, b_b = pack_block(raw[2], raw[3], D_, H_, NH1_, mxu_dtype)
    return dict(w_f=w_f, b_f=b_f, w_b=w_b, b_b=b_b,
                dims=(D_, H_, NH1_), mxu_dtype=mxu_dtype)


# ----------------------------- float64 numpy reference -----------------------
def ref_dual_np(x, raw):
    def elu(v):
        return np.where(v > 0, v, np.expm1(np.minimum(v, 0.0)))

    def made(z, p):
        h = elu(z @ np.asarray(p['wi'], np.float64).T + np.asarray(p['bi'], np.float64))
        for wl, bl in zip(p['wh'], p['bh']):
            h = elu(h @ np.asarray(wl, np.float64).T + np.asarray(bl, np.float64))
        return (h @ np.asarray(p['wo'], np.float64).T + np.asarray(p['bo'], np.float64)
                + z @ np.asarray(p['wd'], np.float64).T)

    z = np.asarray(x, np.float64)
    mu_f = made(z, raw[0]); ls_f = 0.5 * made(z, raw[1])
    x1 = mu_f + z * np.exp(ls_f)
    mu_b = made(x1, raw[2]); ls_b = 0.5 * made(x1, raw[3])
    y = mu_b + x1 * np.exp(ls_b)
    return y, -(ls_f.sum(1) + ls_b.sum(1))


# ----------------------------- main ------------------------------------------
if __name__ == "__main__":
    D_, H_, NH_ = 8, 32, 2        # input_size, hidden_size, num_hiddens
    key = jax.random.PRNGKey(0)
    kx, kp = jax.random.split(key)
    keys = jax.random.split(kp, 4)
    orders = ['A', 'A', 'B', 'B']  # mu_fwd, logvar_fwd, mu_bwd, logvar_bwd
    raw = [init_made_raw(k, D_, H_, NH_, o) for k, o in zip(keys, orders)]

    # 1) exact-semantics check: f32 MXU operands, batch 256 -> 2 grid steps
    x = jax.random.normal(kx, (256, D_), jnp.float32)
    packed_f32 = pack_params(raw, D_, H_, NH_, mxu_dtype=jnp.float32)
    y32, ld32 = iaf_made_dual_block(x, packed_f32)
    jax.block_until_ready((y32, ld32))
    y_ref, ld_ref = ref_dual_np(x, raw)
    assert np.allclose(np.asarray(y32), y_ref, rtol=2e-3, atol=2e-3)
    assert np.allclose(np.asarray(ld32), ld_ref, rtol=2e-3, atol=2e-3)

    # 2) fast path: bf16 MXU operands (f32 accumulate + f32 elementwise),
    #    ragged batch (300) exercises lane padding and the 2-step grid.
    xb = jax.random.normal(jax.random.split(kx)[0], (300, D_), jnp.float32)
    packed_bf16 = pack_params(raw, D_, H_, NH_, mxu_dtype=jnp.bfloat16)
    yb, ldb = iaf_made_dual_block(xb, packed_bf16)
    jax.block_until_ready((yb, ldb))
    yb_ref, ldb_ref = ref_dual_np(xb, raw)
    assert np.allclose(np.asarray(yb), yb_ref, rtol=3e-2, atol=3e-2)
    assert np.allclose(np.asarray(ldb), ldb_ref, rtol=3e-2, atol=3e-2)

    print("KERNEL_OK")
</pallas_src>

<mosaic_0001>
module attributes {stable_mosaic.version = 11 : i64} {
  func.func @dual_block_kernel(%arg0: i32, %arg1: memref<8x128xf32, #tpu.memory_space<vmem>>, %arg2: memref<160x64xf32, #tpu.memory_space<vmem>>, %arg3: memref<160x1xf32, #tpu.memory_space<vmem>>, %arg4: memref<160x64xf32, #tpu.memory_space<vmem>>, %arg5: memref<160x1xf32, #tpu.memory_space<vmem>>, %arg6: memref<9x128xf32, #tpu.memory_space<vmem>>) attributes {dimension_semantics = [#tpu.dimension_semantics<parallel>], iteration_bounds = array<i64: 2>, scalar_prefetch = 0 : i64, scratch_operands = 0 : i64, tpu.core_type = #tpu.core_type<tc>, window_params = [{transform_indices = @transform_0, window_bounds = array<i64: 8, 128>}, {pipeline_mode = #tpu.pipeline_mode<synchronous>, transform_indices = @transform_1, window_bounds = array<i64: 160, 64>}, {pipeline_mode = #tpu.pipeline_mode<synchronous>, transform_indices = @transform_2, window_bounds = array<i64: 160, 1>}, {pipeline_mode = #tpu.pipeline_mode<synchronous>, transform_indices = @transform_3, window_bounds = array<i64: 160, 64>}, {pipeline_mode = #tpu.pipeline_mode<synchronous>, transform_indices = @transform_4, window_bounds = array<i64: 160, 1>}, {transform_indices = @transform_5, window_bounds = array<i64: 9, 128>}]} {
    %c0 = arith.constant 0 : index
    %c0_0 = arith.constant 0 : index
    %0 = vector.load %arg1[%c0, %c0_0] : memref<8x128xf32, #tpu.memory_space<vmem>>, vector<8x128xf32>
    %c0_1 = arith.constant 0 : index
    %c0_2 = arith.constant 0 : index
    %1 = vector.load %arg2[%c0_1, %c0_2] : memref<160x64xf32, #tpu.memory_space<vmem>>, vector<64x8xf32>
    %cst = arith.constant dense<0.000000e+00> : vector<64x128xf32>
    %2 = tpu.matmul %1, %0, %cst {dimension_numbers = #tpu.dot_dimension_numbers<[1], [0], [0], [1], [0, 0, 1, 1], [], []>} : vector<64x8xf32>, vector<8x128xf32>, vector<64x128xf32> -> vector<64x128xf32>
    %c0_3 = arith.constant 0 : index
    %c0_4 = arith.constant 0 : index
    %3 = vector.load %arg3[%c0_3, %c0_4] : memref<160x1xf32, #tpu.memory_space<vmem>>, vector<64x1xf32>
    %4 = vector.broadcast %3 : vector<64x1xf32> to vector<64x128xf32>
    %5 = arith.addf %2, %4 : vector<64x128xf32>
    %cst_5 = arith.constant 0.000000e+00 : f32
    %6 = vector.broadcast %cst_5 : f32 to vector<64x128xf32>
    %7 = arith.cmpf ogt, %5, %6 : vector<64x128xf32>
    %cst_6 = arith.constant 0.000000e+00 : f32
    %8 = vector.broadcast %cst_6 : f32 to vector<64x128xf32>
    %9 = arith.minimumf %5, %8 : vector<64x128xf32>
    %10 = math.exp %9 : vector<64x128xf32>
    %cst_7 = arith.constant 1.000000e+00 : f32
    %11 = vector.broadcast %cst_7 : f32 to vector<64x128xf32>
    %12 = arith.subf %10, %11 : vector<64x128xf32>
    %13 = arith.select %7, %5, %12 : vector<64x128xi1>, vector<64x128xf32>
    %c64 = arith.constant 64 : index
    %c0_8 = arith.constant 0 : index
    %14 = vector.load %arg2[%c64, %c0_8] : memref<160x64xf32, #tpu.memory_space<vmem>>, vector<64x64xf32>
    %cst_9 = arith.constant dense<0.000000e+00> : vector<64x128xf32>
    %15 = tpu.matmul %14, %13, %cst_9 {dimension_numbers = #tpu.dot_dimension_numbers<[1], [0], [0], [1], [0, 0, 1, 1], [], []>} : vector<64x64xf32>, vector<64x128xf32>, vector<64x128xf32> -> vector<64x128xf32>
    %c64_10 = arith.constant 64 : index
    %c0_11 = arith.constant 0 : index
    %16 = vector.load %arg3[%c64_10, %c0_11] : memref<160x1xf32, #tpu.memory_space<vmem>>, vector<64x1xf32>
    %17 = vector.broadcast %16 : vector<64x1xf32> to vector<64x128xf32>
    %18 = arith.addf %15, %17 : vector<64x128xf32>
    %cst_12 = arith.constant 0.000000e+00 : f32
    %19 = vector.broadcast %cst_12 : f32 to vector<64x128xf32>
    %20 = arith.cmpf ogt, %18, %19 : vector<64x128xf32>
    %cst_13 = arith.constant 0.000000e+00 : f32
    %21 = vector.broadcast %cst_13 : f32 to vector<64x128xf32>
    %22 = arith.minimumf %18, %21 : vector<64x128xf32>
    %23 = math.exp %22 : vector<64x128xf32>
    %cst_14 = arith.constant 1.000000e+00 : f32
    %24 = vector.broadcast %cst_14 : f32 to vector<64x128xf32>
    %25 = arith.subf %23, %24 : vector<64x128xf32>
    %26 = arith.select %20, %18, %25 : vector<64x128xi1>, vector<64x128xf32>
    %c128 = arith.constant 128 : index
    %c0_15 = arith.constant 0 : index
    %27 = vector.load %arg2[%c128, %c0_15] : memref<160x64xf32, #tpu.memory_space<vmem>>, vector<16x64xf32>
    %cst_16 = arith.constant dense<0.000000e+00> : vector<16x128xf32>
    %28 = tpu.matmul %27, %26, %cst_16 {dimension_numbers = #tpu.dot_dimension_numbers<[1], [0], [0], [1], [0, 0, 1, 1], [], []>} : vector<16x64xf32>, vector<64x128xf32>, vector<16x128xf32> -> vector<16x128xf32>
    %c144 = arith.constant 144 : index
    %c0_17 = arith.constant 0 : index
    %29 = vector.load %arg2[%c144, %c0_17] : memref<160x64xf32, #tpu.memory_space<vmem>>, vector<16x8xf32>
    %cst_18 = arith.constant dense<0.000000e+00> : vector<16x128xf32>
    %30 = tpu.matmul %29, %0, %cst_18 {dimension_numbers = #tpu.dot_dimension_numbers<[1], [0], [0], [1], [0, 0, 1, 1], [], []>} : vector<16x8xf32>, vector<8x128xf32>, vector<16x128xf32> -> vector<16x128xf32>
    %31 = arith.addf %28, %30 : vector<16x128xf32>
    %c128_19 = arith.constant 128 : index
    %c0_20 = arith.constant 0 : index
    %32 = vector.load %arg3[%c128_19, %c0_20] : memref<160x1xf32, #tpu.memory_space<vmem>>, vector<16x1xf32>
    %33 = vector.broadcast %32 : vector<16x1xf32> to vector<16x128xf32>
    %34 = arith.addf %31, %33 : vector<16x128xf32>
    %35 = vector.extract_strided_slice %34 {offsets = [0, 0], sizes = [8, 128], strides = [1, 1]} : vector<16x128xf32> to vector<8x128xf32>
    %36 = vector.extract_strided_slice %34 {offsets = [8, 0], sizes = [8, 128], strides = [1, 1]} : vector<16x128xf32> to vector<8x128xf32>
    %37 = math.exp %36 : vector<8x128xf32>
    %38 = arith.mulf %0, %37 : vector<8x128xf32>
    %39 = arith.addf %35, %38 : vector<8x128xf32>
    %c0_21 = arith.constant 0 : index
    %c0_22 = arith.constant 0 : index
    %40 = vector.load %arg4[%c0_21, %c0_22] : memref<160x64xf32, #tpu.memory_space<vmem>>, vector<64x8xf32>
    %cst_23 = arith.constant dense<0.000000e+00> : vector<64x128xf32>
    %41 = tpu.matmul %40, %39, %cst_23 {dimension_numbers = #tpu.dot_dimension_numbers<[1], [0], [0], [1], [0, 0, 1, 1], [], []>} : vector<64x8xf32>, vector<8x128xf32>, vector<64x128xf32> -> vector<64x128xf32>
    %c0_24 = arith.constant 0 : index
    %c0_25 = arith.constant 0 : index
    %42 = vector.load %arg5[%c0_24, %c0_25] : memref<160x1xf32, #tpu.memory_space<vmem>>, vector<64x1xf32>
    %43 = vector.broadcast %42 : vector<64x1xf32> to vector<64x128xf32>
    %44 = arith.addf %41, %43 : vector<64x128xf32>
    %cst_26 = arith.constant 0.000000e+00 : f32
    %45 = vector.broadcast %cst_26 : f32 to vector<64x128xf32>
    %46 = arith.cmpf ogt, %44, %45 : vector<64x128xf32>
    %cst_27 = arith.constant 0.000000e+00 : f32
    %47 = vector.broadcast %cst_27 : f32 to vector<64x128xf32>
    %48 = arith.minimumf %44, %47 : vector<64x128xf32>
    %49 = math.exp %48 : vector<64x128xf32>
    %cst_28 = arith.constant 1.000000e+00 : f32
    %50 = vector.broadcast %cst_28 : f32 to vector<64x128xf32>
    %51 = arith.subf %49, %50 : vector<64x128xf32>
    %52 = arith.select %46, %44, %51 : vector<64x128xi1>, vector<64x128xf32>
    %c64_29 = arith.constant 64 : index
    %c0_30 = arith.constant 0 : index
    %53 = vector.load %arg4[%c64_29, %c0_30] : memref<160x64xf32, #tpu.memory_space<vmem>>, vector<64x64xf32>
    %cst_31 = arith.constant dense<0.000000e+00> : vector<64x128xf32>
    %54 = tpu.matmul %53, %52, %cst_31 {dimension_numbers = #tpu.dot_dimension_numbers<[1], [0], [0], [1], [0, 0, 1, 1], [], []>} : vector<64x64xf32>, vector<64x128xf32>, vector<64x128xf32> -> vector<64x128xf32>
    %c64_32 = arith.constant 64 : index
    %c0_33 = arith.constant 0 : index
    %55 = vector.load %arg5[%c64_32, %c0_33] : memref<160x1xf32, #tpu.memory_space<vmem>>, vector<64x1xf32>
    %56 = vector.broadcast %55 : vector<64x1xf32> to vector<64x128xf32>
    %57 = arith.addf %54, %56 : vector<64x128xf32>
    %cst_34 = arith.constant 0.000000e+00 : f32
    %58 = vector.broadcast %cst_34 : f32 to vector<64x128xf32>
    %59 = arith.cmpf ogt, %57, %58 : vector<64x128xf32>
    %cst_35 = arith.constant 0.000000e+00 : f32
    %60 = vector.broadcast %cst_35 : f32 to vector<64x128xf32>
    %61 = arith.minimumf %57, %60 : vector<64x128xf32>
    %62 = math.exp %61 : vector<64x128xf32>
    %cst_36 = arith.constant 1.000000e+00 : f32
    %63 = vector.broadcast %cst_36 : f32 to vector<64x128xf32>
    %64 = arith.subf %62, %63 : vector<64x128xf32>
    %65 = arith.select %59, %57, %64 : vector<64x128xi1>, vector<64x128xf32>
    %c128_37 = arith.constant 128 : index
    %c0_38 = arith.constant 0 : index
    %66 = vector.load %arg4[%c128_37, %c0_38] : memref<160x64xf32, #tpu.memory_space<vmem>>, vector<16x64xf32>
    %cst_39 = arith.constant dense<0.000000e+00> : vector<16x128xf32>
    %67 = tpu.matmul %66, %65, %cst_39 {dimension_numbers = #tpu.dot_dimension_numbers<[1], [0], [0], [1], [0, 0, 1, 1], [], []>} : vector<16x64xf32>, vector<64x128xf32>, vector<16x128xf32> -> vector<16x128xf32>
    %c144_40 = arith.constant 144 : index
    %c0_41 = arith.constant 0 : index
    %68 = vector.load %arg4[%c144_40, %c0_41] : memref<160x64xf32, #tpu.memory_space<vmem>>, vector<16x8xf32>
    %cst_42 = arith.constant dense<0.000000e+00> : vector<16x128xf32>
    %69 = tpu.matmul %68, %39, %cst_42 {dimension_numbers = #tpu.dot_dimension_numbers<[1], [0], [0], [1], [0, 0, 1, 1], [], []>} : vector<16x8xf32>, vector<8x128xf32>, vector<16x128xf32> -> vector<16x128xf32>
    %70 = arith.addf %67, %69 : vector<16x128xf32>
    %c128_43 = arith.constant 128 : index
    %c0_44 = arith.constant 0 : index
    %71 = vector.load %arg5[%c128_43, %c0_44] : memref<160x1xf32, #tpu.memory_space<vmem>>, vector<16x1xf32>
    %72 = vector.broadcast %71 : vector<16x1xf32> to vector<16x128xf32>
    %73 = arith.addf %70, %72 : vector<16x128xf32>
    %74 = vector.extract_strided_slice %73 {offsets = [0, 0], sizes = [8, 128], strides = [1, 1]} : vector<16x128xf32> to vector<8x128xf32>
    %75 = vector.extract_strided_slice %73 {offsets = [8, 0], sizes = [8, 128], strides = [1, 1]} : vector<16x128xf32> to vector<8x128xf32>
    %76 = math.exp %75 : vector<8x128xf32>
    %77 = arith.mulf %39, %76 : vector<8x128xf32>
    %78 = arith.addf %74, %77 : vector<8x128xf32>
    %79 = arith.addf %36, %75 : vector<8x128xf32>
    %cst_45 = arith.constant dense<0.000000e+00> : vector<128xf32>
    %80 = vector.multi_reduction <add>, %79, %cst_45 [0] : vector<8x128xf32> to vector<128xf32>
    %81 = vector.shape_cast %80 : vector<128xf32> to vector<1x128xf32>
    %cst_46 = arith.constant 0.000000e+00 : f32
    %82 = vector.broadcast %cst_46 : f32 to vector<1x128xf32>
    %83 = arith.subf %82, %81 : vector<1x128xf32>
    %c0_47 = arith.constant 0 : index
    %c0_48 = arith.constant 0 : index
    %84 = vector.load %arg6[%c0_47, %c0_48] : memref<9x128xf32, #tpu.memory_space<vmem>>, vector<8x128xf32>
    tpu.vector_store %arg6[%c0_47, %c0_48], %78 {strides = array<i32>} : memref<9x128xf32, #tpu.memory_space<vmem>>, vector<8x128xf32>,
    %c8 = arith.constant 8 : index
    %c0_49 = arith.constant 0 : index
    %85 = vector.load %arg6[%c8, %c0_49] : memref<9x128xf32, #tpu.memory_space<vmem>>, vector<1x128xf32>
    tpu.vector_store %arg6[%c8, %c0_49], %83 {strides = array<i32>} : memref<9x128xf32, #tpu.memory_space<vmem>>, vector<1x128xf32>,
    return
  }
  func.func @transform_0(%arg0: i32) -> (i32, i32) {
    %c0_i32 = arith.constant 0 : i32
    %c0_i32_0 = arith.constant 0 : i32
    return %c0_i32, %arg0 : i32, i32
  }
  func.func @transform_1(%arg0: i32) -> (i32, i32) {
    %c0_i32 = arith.constant 0 : i32
    %c0_i32_0 = arith.constant 0 : i32
    %c0_i32_1 = arith.constant 0 : i32
    return %c0_i32, %c0_i32_0 : i32, i32
  }
  func.func @transform_2(%arg0: i32) -> (i32, i32) {
    %c0_i32 = arith.constant 0 : i32
    %c0_i32_0 = arith.constant 0 : i32
    %c0_i32_1 = arith.constant 0 : i32
    return %c0_i32, %c0_i32_0 : i32, i32
  }
  func.func @transform_3(%arg0: i32) -> (i32, i32) {
    %c0_i32 = arith.constant 0 : i32
    %c0_i32_0 = arith.constant 0 : i32
    %c0_i32_1 = arith.constant 0 : i32
    return %c0_i32, %c0_i32_0 : i32, i32
  }
  func.func @transform_4(%arg0: i32) -> (i32, i32) {
    %c0_i32 = arith.constant 0 : i32
    %c0_i32_0 = arith.constant 0 : i32
    %c0_i32_1 = arith.constant 0 : i32
    return %c0_i32, %c0_i32_0 : i32, i32
  }
  func.func @transform_5(%arg0: i32) -> (i32, i32) {
    %c0_i32 = arith.constant 0 : i32
    %c0_i32_0 = arith.constant 0 : i32
    return %c0_i32, %arg0 : i32, i32
  }
}

</mosaic_0001>

<bundles_post_ra>
// kernel: tpu_custom_call.1
= control target key start
LH: loop header
LB: loop body
LE: loop exit
PB: predicated region body
PF: predicated region fallthrough
CT: control target
= control target key end

     0   :  { %10 = vsyncpa [#allocation3], 0  ;;  %s2576_s0 = inlined_call_operand.vmem [shape: f32[8,256], index: 0, kind: input, shape index: {}]   ;;  %s2577_s1 = inlined_call_operand.vmem [shape: f32[160,64], index: 1, kind: input, shape index: {}]   ;;  %s2578_s2 = inlined_call_operand.vmem [shape: f32[160,1], index: 2, kind: input, shape index: {}]   ;;  %s2579_s3 = inlined_call_operand.vmem [shape: f32[160,64], index: 3, kind: input, shape index: {}]   ;;  %s2580_s4 = inlined_call_operand.vmem [shape: f32[160,1], index: 4, kind: input, shape index: {}]   ;;  %s2581_s5 = inlined_call_operand.hbm [shape: f32[9,256], index: 5, kind: output, shape index: {}]  }
   0x1   :  { %12 = vsyncpa [#allocation3 + $0x1], 0  ;;  %s2108_s18 = smov 0   ;;  %s2110_s19 = smov 0  }
   0x2   :  { %s2112_s20 = smov 0   ;;  %s2114_s21 = smov 0  }
   0x3 LB: > { %s2129_s22 = sadd.s32 4294967295, %s2071_s21   ;;  %s1608_s23 = sadd.s32 4294967294, %s2071_s21   ;;  %s2071_s21 = sphi %s2114_s21, %s2587_s21   ;;  %s2067_s20 = sphi %s2112_s20, %s2586_s20   ;;  %s2063_s19 = sphi %s2110_s19, %s2585_s19   ;;  %s2059_s18 = sphi %s2108_s18, %s2584_s18  }
   0x4   : > { %s2133_s24 = sadd.s32 1, %s2071_s21   ;;  %s135_s25 = sadd.s32 1, %s2067_s20 }
   0x5   : > { %s132_s26 = ssub.s32 %s2071_s21, %s2133_s24  ;;  %p145_p0 = scmp.ne.s32.totalorder %s2067_s20, %s2063_s19 }
   0x6   : > { %p133_p1 = scmp.eq.s32.totalorder %s132_s26, 0  ;;  %p146_p2 = scmp.eq.s32.totalorder %s2129_s22, 1 }
   0x7   : > { %p151_p3 = scmp.ne.s32.totalorder %s2063_s19, %s2059_s18  ;;  %p152_p4 = scmp.eq.s32.totalorder %s1608_s23, 1 }
   0x8   : > { %s2144_s27 = scalar_select %p133_p1, %s2067_s20, %s135_s25  }
   0x9   : > { %p2146_p5 = por %p146_p2, %p145_p0  ;;  %p2150_p6 = por %p152_p4, %p151_p3 }
   0xa   : > { %p1611_p7 = scmp.ge.s32.totalorder %s2071_s21, 1  ;;  %p189_p8 = scmp.lt.s32.totalorder %s2071_s21, 3 }
   0xc   : > { %p190_p9 = pnand %p1611_p7, %p189_p8 }
   0xd   : > { %p216_p10 = scmp.lt.s32.totalorder (!%p190_p9), %s2129_s22, 1  ;;  %s213_s23 = sand.u32 (!%p190_p9), 1, %s2063_s19  }
   0xe   : > { %193 = sbr.rel (%p190_p9) target bundleno = 1453 (0x5ad), region = 40  ;;  %s1612_s25 = sshll.u32 (!%p190_p9), %s213_s23, 4 }
   0xf   : > { %s215_s26 = scalar_lea.vmem (!%p190_p9), [#allocation2], %s1612_s25  ;;  %s1687_s6 = sshll.u32 (!%p190_p9), %s2129_s22, 7 }
  0x10   : > { %s1546_s30 = sshll.u32 (!%p190_p9), %s215_s26, 4  ;;  %s2534_s9 = scalar_lea.hbm (!%p190_p9), %s2581_s5, %s1687_s6  ;;  %s2529_s30 = int_to_ptr.vmem [resolvable:$true] %s1546_s30 }
  0x11   : > { %s2536_s10 = scalar_lea.sflag (!%p190_p9), [#allocation3], %s213_s23  ;;  %s2074_s11 = smov (!%p190_p9), [#allocation2]  }
  0x13   : > { %v221_v0 = vld [vmem:[%s2577_s1] sm:$0xff]  ;;  %vm277_vm0 = vcmask 64512   ;;  %v2073_v1 = vmov 0   ;;  %s217_s7 = scalar_select %p216_p10, %s2129_s22, 1  ;;  %v236_v2 = vld [vmem:[%s2578_s2 + $0x38] sm:$0xff]  ;;  %v234_v3 = vld [vmem:[%s2578_s2 + $0x28] sm:$0xff] }
  0x14   : > { %1768 = vmatprep.mubr.msk.f32.mxu0 %vm277_vm0, %v221_v0  ;;  %1941 = vset.pattern.permute.xlu0 %v2073_v1  ;;  %v235_v4 = vld [vmem:[%s2578_s2 + $0x30] sm:$0xff]  ;;  %v233_v5 = vld [vmem:[%s2578_s2 + $0x20] sm:$0xff]  ;;  %v222_v7 = vld [vmem:[%s2577_s1 + $0x8] sm:$0xff]  ;;  %vm511_vm1 = vcmask 523264   ;;  %s2011_s22 = scalar_lea.vmem %s2529_s30, 256 }
  0x15   : > { %1942 = vset.pattern.permute.xlu1 %v2073_v1  ;;  %274 = vperm.xlu0 %1941, %v236_v2   ;;  %s1613_s12 = sshll.u32 %s217_s7, 3  ;;  %v223_v8 = vld [vmem:[%s2577_s1 + $0x10] sm:$0xff]  ;;  %v232_v9 = vld [vmem:[%s2578_s2 + $0x18] sm:$0xff]  ;;  %v225_v12 = vld [vmem:[%s2577_s1 + $0x20] sm:$0xff]  ;;  %p2012_p11 = scmp.ne.s32.totalorder %s2529_s30, %s2011_s22 }
  0x16   : > { %264 = vperm.xlu1 %1942, %v234_v3   ;;  %s219_s17 = scalar_lea.vmem %s2576_s0, %s1613_s12  ;;  %v231_v10 = vld [vmem:[%s2578_s2 + $0x10] sm:$0xff]  ;;  %v224_v11 = vld [vmem:[%s2577_s1 + $0x18] sm:$0xff]  ;;  %v230_v13 = vld [vmem:[%s2578_s2 + $0x8] sm:$0xff]  ;;  %s2015_s12 = sshll.u32 %s2074_s11, 4  ;;  %s2016_s12 = int_to_ptr.vmem [resolvable:$false] %s2015_s12 }
  0x17   : > { %v2177_v6 = vld [vmem:[%s219_s17] sm:$0xff]  ;;  %v226_v15 = vld [vmem:[%s2577_s1 + $0x28] sm:$0xff]  ;;  %v227_v16 = vld [vmem:[%s2577_s1 + $0x30] sm:$0xff]  ;;  %p2013_p12 = pnand %p2012_p11, %p2146_p5  ;;  %s2017_s13 = scalar_lea.vmem %s2016_s12, 512 }
  0x18   : > { %1766 = vmatprep.subr.mxu0 %v2177_v6  ;;  %v229_v14 = vld [vmem:[%s2578_s2] sm:$0xff]  ;;  %v470_v17 = vld [vmem:[%s2578_s2 + $0x78] sm:$0xff]  ;;  %v469_v18 = vld [vmem:[%s2578_s2 + $0x70] sm:$0xff]  ;;  %p2018_p0 = scmp.lt.s32.totalorder %s2529_s30, %s2016_s12  ;;  %p2019_p1 = scmp.lt.s32.totalorder %s2017_s13, %s2011_s22 }
  0x19   : > { %269 = vperm.xlu0 %1941, %v235_v4   ;;  %1767 = vmatpush3.msra.mxu0 %v2177_v6  ;;  %v228_v19 = vld [vmem:[%s2577_s1 + $0x38] sm:$0xff]  ;;  %v468_v20 = vld [vmem:[%s2578_s2 + $0x68] sm:$0xff]  ;;  %v467_v21 = vld [vmem:[%s2578_s2 + $0x60] sm:$0xff]  ;;  %p2014_p13 = pneg %p2013_p12 }
  0x1a   : > { %259 = vperm.xlu1 %1942, %v233_v5   ;;  %1769 = vmatmul.mubr.msk.f32.vlgmr.msra.gmra.mxu0 %vm277_vm0, %v222_v7  ;;  %v466_v22 = vld [vmem:[%s2578_s2 + $0x58] sm:$0xff]  ;;  %v465_v23 = vld [vmem:[%s2578_s2 + $0x50] sm:$0xff]  ;;  %v464_v24 = vld [vmem:[%s2578_s2 + $0x48] sm:$0xff]  ;;  %p2020_p2 = por %p2019_p1, %p2018_p0 }
  0x1b   : > { %1808 = vmatprep.subr.mxu0 %v2177_v6  ;;  %1771 = vmatprep.mubr.msk.f32.mxu0 %vm277_vm0, %v223_v8  ;;  %v463_v25 = vld [vmem:[%s2578_s2 + $0x40] sm:$0xff]  ;;  %v856_v26 = vld [vmem:[%s2578_s2 + $0x88] sm:$0xff]  ;;  %v888_v28 = vld [vmem:[%s2580_s4 + $0x38] sm:$0xff] }
  0x1c   : > { %1809 = vmatpush3.msra.mxu0 %v2177_v6  ;;  %v855_v27 = vld [vmem:[%s2578_s2 + $0x80] sm:$0xff]  ;;  %v887_v29 = vld [vmem:[%s2580_s4 + $0x30] sm:$0xff]  ;;  %v886_v30 = vld [vmem:[%s2580_s4 + $0x28] sm:$0xff]  ;;  %p2021_p3 = pnand %p2020_p2, %p2014_p13 }
  0x1d   : > { %254 = vperm.xlu0 %1941, %v232_v9   ;;  %v885_v31 = vld [vmem:[%s2580_s4 + $0x20] sm:$0xff]  ;;  %v884_v32 = vld [vmem:[%s2580_s4 + $0x18] sm:$0xff]  ;;  %v883_v33 = vld [vmem:[%s2580_s4 + $0x10] sm:$0xff] }
  0x1e   : > { %249 = vperm.xlu1 %1942, %v231_v10   ;;  %1772 = vmatmul.mubr.msk.f32.gmra.mxu0 %vm277_vm0, %v224_v11  ;;  %v882_v34 = vld [vmem:[%s2580_s4 + $0x8] sm:$0xff]  ;;  %v881_v35 = vld [vmem:[%s2580_s4] sm:$0xff]  ;;  %v1121_v36 = vld [vmem:[%s2580_s4 + $0x78] sm:$0xff] }
  0x1f   : > { %1774 = vmatprep.mubr.msk.f32.mxu0 %vm277_vm0, %v225_v12  ;;  %v1120_v37 = vld [vmem:[%s2580_s4 + $0x70] sm:$0xff]  ;;  %v1119_v38 = vld [vmem:[%s2580_s4 + $0x68] sm:$0xff]  ;;  %v1118_v39 = vld [vmem:[%s2580_s4 + $0x60] sm:$0xff] }
  0x20   : > { %v1117_v40 = vld [vmem:[%s2580_s4 + $0x58] sm:$0xff]  ;;  %v1116_v41 = vld [vmem:[%s2580_s4 + $0x50] sm:$0xff]  ;;  %v1115_v42 = vld [vmem:[%s2580_s4 + $0x48] sm:$0xff] }
  0x21   : > { %244 = vperm.xlu0 %1941, %v230_v13   ;;  %v1114_v43 = vld [vmem:[%s2580_s4 + $0x40] sm:$0xff]  ;;  %v1506_v44 = vld [vmem:[%s2580_s4 + $0x88] sm:$0xff] }
  0x22   : > { %239 = vperm.xlu1 %1942, %v229_v14   ;;  %1775 = vmatmul.mubr.msk.f32.gmra.mxu0 %vm277_vm0, %v226_v15  ;;  %v1505_v45 = vld [vmem:[%s2580_s4 + $0x80] sm:$0xff] }
  0x23   : > { %1777 = vmatprep.mubr.msk.f32.mxu0 %vm277_vm0, %v227_v16  ;;  %v455_v46 = vld [vmem:[%s2577_s1 + $0x40] sm:$0xff] }
  0x24   : > { %1796 = vmatprep.mubr.msk.f32.mxu1 %vm511_vm1, %v455_v46 }
  0x25   : > { %508 = vperm.xlu0 %1941, %v470_v17  }
  0x26   : > { %503 = vperm.xlu1 %1942, %v469_v18   ;;  %1778 = vmatmul.mubr.msk.f32.gmra.mxu0 %vm277_vm0, %v228_v19 }
  0x29   : > { %498 = vperm.xlu0 %1941, %v468_v20  }
  0x2a   : > { %493 = vperm.xlu1 %1942, %v467_v21  }
  0x2d   : > { %488 = vperm.xlu0 %1941, %v466_v22  }
  0x2e   : > { %483 = vperm.xlu1 %1942, %v465_v23  }
  0x31   : > { %478 = vperm.xlu0 %1941, %v464_v24  }
  0x32   : > { %473 = vperm.xlu1 %1942, %v463_v25  }
  0x35   : > { %864 = vperm.xlu0 %1941, %v856_v26  }
  0x36   : > { %859 = vperm.xlu1 %1942, %v855_v27  }
  0x39   : > { %926 = vperm.xlu0 %1941, %v888_v28  }
  0x3a   : > { %921 = vperm.xlu1 %1942, %v887_v29  }
  0x3d   : > { %916 = vperm.xlu0 %1941, %v886_v30  }
  0x3e   : > { %911 = vperm.xlu1 %1942, %v885_v31  }
  0x41   : > { %906 = vperm.xlu0 %1941, %v884_v32  }
  0x42   : > { %901 = vperm.xlu1 %1942, %v883_v33  }
  0x45   : > { %896 = vperm.xlu0 %1941, %v882_v34  }
  0x46   : > { %891 = vperm.xlu1 %1942, %v881_v35  }
  0x49   : > { %1159 = vperm.xlu0 %1941, %v1121_v36  }
  0x4a   : > { %1154 = vperm.xlu1 %1942, %v1120_v37  }
  0x4d   : > { %1149 = vperm.xlu0 %1941, %v1119_v38  }
  0x4e   : > { %1144 = vperm.xlu1 %1942, %v1118_v39  }
  0x51   : > { %1139 = vperm.xlu0 %1941, %v1117_v40  }
  0x52   : > { %1134 = vperm.xlu1 %1942, %v1116_v41  }
  0x55   : > { %1129 = vperm.xlu0 %1941, %v1115_v42  }
  0x56   : > { %1124 = vperm.xlu1 %1942, %v1114_v43  }
  0x59   : > { %1514 = vperm.xlu0 %1941, %v1506_v44  }
  0x5a   : > { %1509 = vperm.xlu1 %1942, %v1505_v45  }
  0x90   : > { %v275_v47 = vpop.permute.xlu0 %274 }
  0x91   : > { %v265_v48 = vpop.permute.xlu1 %264 }
  0x94   : > { %v270_v50 = vpop.permute.xlu0 %269 }
  0x95   : > { %v260_v52 = vpop.permute.xlu1 %259 }
  0x98   : > { %v255_v55 = vpop.permute.xlu0 %254 }
  0x99   : > { %v250_v58 = vpop.permute.xlu1 %249 }
  0x9c   : > { %v245_v3 = vpop.permute.xlu0 %244 }
  0x9d   : > { %v240_v11 = vpop.permute.xlu1 %239 }
  0xda   : > { %v1770_v49 = vpop.f32.mrf.mxu0 }
  0xdb   : > { %v2315_v7 = vadd.f32 %v1770_v49, %v245_v3  ;;  %v457_v49 = vld [vmem:[%s2577_s1 + $0x50] sm:$0xff] }
  0xdc   : > { %v368_v51 = vpop.f32.mrf.mxu0 }
  0xdd   : > { %v2318_v13 = vadd.f32 %v368_v51, %v240_v11  ;;  %v416_v17 = vmin.f32 %v2315_v7, 0.0  ;;  %vm408_vm8 = vcmp.gt.f32.partialorder %v2315_v7, 0.0  ;;  %v459_v51 = vld [vmem:[%s2577_s1 + $0x60] sm:$0xff] }
  0xde   : > { %v1773_v53 = vpop.f32.mrf.mxu0 }
  0xdf   : > { %v2311_v60 = vadd.f32 %v1773_v53, %v255_v55  ;;  %v415_v20 = vmin.f32 %v2318_v13, 0.0  ;;  %v425_v22 = vmul.f32 1.442695, %v416_v17  ;;  %vm407_vm9 = vcmp.gt.f32.partialorder %v2318_v13, 0.0  ;;  %v461_v53 = vld [vmem:[%s2577_s1 + $0x70] sm:$0xff] }
  0xe0   : > { %v378_v54 = vpop.f32.mrf.mxu0  ;;  %v691_v55 = vld [vmem:[%s2577_s1 + $0x90] sm:$0xff] }
  0xe1   : > { %v2313_v0 = vadd.f32 %v378_v54, %v250_v58  ;;  %v418_v8 = vmin.f32 %v2311_v60, 0.0  ;;  %v423_v23 = vmul.f32 1.442695, %v415_v20  ;;  %vm410_vm6 = vcmp.gt.f32.partialorder %v2311_v60, 0.0  ;;  %v462_v54 = vld [vmem:[%s2577_s1 + $0x78] sm:$0xff]  ;;  %1810 = vmatprep.mubr.msk.f32.mxu0 %vm277_vm0, %v691_v55  ;;  %v509_v58 = vpop.permute.xlu0 %508 }
  0xe2   : > { %v1776_v56 = vpop.f32.mrf.mxu0 }
  0xe3   : > { %v394_v57 = vadd.f32 %v1776_v56, %v265_v48  ;;  %v417_v14 = vmin.f32 %v2313_v0, 0.0  ;;  %v429_v18 = vmul.f32 1.442695, %v418_v8  ;;  %vm409_vm7 = vcmp.gt.f32.partialorder %v2313_v0, 0.0  ;;  %v456_v48 = vld [vmem:[%s2577_s1 + $0x48] sm:$0xff]  ;;  %v692_v56 = vld [vmem:[%s2577_s1 + $0x98] sm:$0xff] }
  0xe4   : > { %v388_v59 = vpop.f32.mrf.mxu0  ;;  %1811 = vmatmul.mubr.msk.f32.vlgmr.msra.gmra.mxu0 %vm277_vm0, %v692_v56 }
  0xe5   : > { %v420_v61 = vmin.f32 %v394_v57, 0.0  ;;  %v389_v62 = vadd.f32 %v388_v59, %v260_v52  ;;  %v427_v21 = vmul.f32 1.442695, %v417_v14  ;;  %vm412_vm4 = vcmp.gt.f32.partialorder %v394_v57, 0.0  ;;  %v460_v52 = vld [vmem:[%s2577_s1 + $0x68] sm:$0xff]  ;;  %v504_v59 = vpop.permute.xlu1 %503 }
  0xe6   : > { %v1779_v63 = vpop.f32.mrf.mxu0 }
  0xe7   : > { %v419_v1 = vmin.f32 %v389_v62, 0.0  ;;  %v404_v2 = vadd.f32 %v1779_v63, %v275_v47  ;;  %v433_v4 = vmul.f32 1.442695, %v420_v61  ;;  %vm411_vm5 = vcmp.gt.f32.partialorder %v389_v62, 0.0  ;;  %v499_v61 = vpop.permute.xlu0 %498 }
  0xe8   : > { %v398_v5 = vpop.f32.mrf.mxu0 }
  0xe9   : > { %v422_v9 = vmin.f32 %v404_v2, 0.0  ;;  %v399_v10 = vadd.f32 %v398_v5, %v270_v50  ;;  %v431_v12 = vmul.f32 1.442695, %v419_v1  ;;  %1943 = vpow2.f32 %v433_v4  ;;  %v458_v50 = vld [vmem:[%s2577_s1 + $0x58] sm:$0xff]  ;;  %v494_v63 = vpop.permute.xlu1 %493 }
  0xea   : > { %vm414_vm2 = vcmp.gt.f32.partialorder %v404_v2, 0.0 }
  0xeb   : > { %v437_v15 = vmul.f32 1.442695, %v422_v9  ;;  %v421_v16 = vmin.f32 %v399_v10, 0.0  ;;  %vm413_vm3 = vcmp.gt.f32.partialorder %v399_v10, 0.0 }
  0xed   : > { %1945 = vpow2.f32 %v437_v15  ;;  %v435_v19 = vmul.f32 1.442695, %v421_v16  ;;  %v484_v5 = vpop.permute.xlu1 %483 }
  0xee   : > { %1947 = vpow2.f32 %v431_v12 }
  0xef   : > { %1949 = vpow2.f32 %v435_v19 }
  0xf0   : > { %1951 = vpow2.f32 %v429_v18 }
  0xf1   : > { %1953 = vpow2.f32 %v427_v21 }
  0xf2   : > { %1955 = vpow2.f32 %v425_v22  ;;  %v474_v22 = vpop.permute.xlu1 %473 }
  0xf3   : > { %1957 = vpow2.f32 %v423_v23 }
  0xf6   : > { %v1944_v24 = vpop.eup %1943 }
  0xf7   : > { %v1627_v31 = vadd.f32 -1.0, %v1944_v24 }
  0xf9   : > { %v452_v36 = vsel %vm412_vm4, %v394_v57, %v1627_v31  ;;  %v689_v57 = vld [vmem:[%s2577_s1 + $0x80] sm:$0xff] }
  0xfa   : > { %v1946_v25 = vpop.eup %1945 }
  0xfb   : > { %v1948_v26 = vpop.eup %1947  ;;  %v1629_v27 = vadd.f32 -1.0, %v1946_v25 }
  0xfc   : > { %v1950_v28 = vpop.eup %1949  ;;  %v1626_v34 = vadd.f32 -1.0, %v1948_v26 }
  0xfd   : > { %v454_v29 = vsel %vm414_vm2, %v404_v2, %v1629_v27  ;;  %v1628_v30 = vadd.f32 -1.0, %v1950_v28  ;;  %v1952_v32 = vpop.eup %1951  ;;  %v489_v2 = vpop.permute.xlu0 %488 }
  0xfe   : > { %1780 = vmatprep.subr.mxu1 %v454_v29  ;;  %v1954_v35 = vpop.eup %1953  ;;  %v1625_v37 = vadd.f32 -1.0, %v1952_v32  ;;  %v451_v39 = vsel %vm411_vm5, %v389_v62, %v1626_v34 }
  0xff   : > { %1781 = vmatpush3.msra.mxu1 %v454_v29  ;;  %v453_v33 = vsel %vm413_vm3, %v399_v10, %v1628_v30  ;;  %v1956_v38 = vpop.eup %1955  ;;  %v1624_v40 = vadd.f32 -1.0, %v1954_v35 }
 0x100   : > { %1782 = vmatprep.subr.mxu1 %v453_v33  ;;  %v1958_v41 = vpop.eup %1957  ;;  %v450_v42 = vsel %vm410_vm6, %v2311_v60, %v1625_v37  ;;  %v1623_v43 = vadd.f32 -1.0, %v1956_v38 }
 0x101   : > { %1783 = vmatpush3.msra.mxu1 %v453_v33  ;;  %v449_v44 = vsel %vm409_vm7, %v2313_v0, %v1624_v40  ;;  %v1622_v45 = vadd.f32 -1.0, %v1958_v41  ;;  %v479_v15 = vpop.permute.xlu0 %478 }
 0x102   : > { %1784 = vmatprep.subr.mxu1 %v452_v36  ;;  %v448_v46 = vsel %vm408_vm8, %v2315_v7, %v1623_v43 }
 0x103   : > { %1785 = vmatpush3.msra.mxu1 %v452_v36  ;;  %v447_v47 = vsel %vm407_vm9, %v2318_v13, %v1622_v45 }
 0x104   : > { %1786 = vmatprep.subr.mxu1 %v451_v39 }
 0x105   : > { %1787 = vmatpush3.msra.mxu1 %v451_v39 }
 0x106   : > { %1788 = vmatprep.subr.mxu1 %v450_v42 }
 0x107   : > { %1789 = vmatpush3.msra.mxu1 %v450_v42 }
 0x108   : > { %1790 = vmatprep.subr.mxu1 %v449_v44 }
 0x109   : > { %1791 = vmatpush3.msra.mxu1 %v449_v44 }
 0x10a   : > { %1792 = vmatprep.subr.mxu1 %v448_v46 }
 0x10b   : > { %1793 = vmatpush3.msra.mxu1 %v448_v46 }
 0x10c   : > { %1794 = vmatprep.subr.mxu1 %v447_v47 }
 0x10d   : > { %1795 = vmatpush3.msra.mxu1 %v447_v47 }
 0x10e   : > { %1797 = vmatmul.mubr.msk.f32.vlgmr.msra.gmra.mxu1 %vm511_vm1, %v456_v48 }
 0x10f   : > { %1799 = vmatprep.mubr.msk.f32.mxu1 %vm511_vm1, %v457_v49 }
 0x112   : > { %1800 = vmatmul.mubr.msk.f32.gmra.mxu1 %vm511_vm1, %v458_v50 }
 0x113   : > { %1802 = vmatprep.mubr.msk.f32.mxu1 %vm511_vm1, %v459_v51 }
 0x116   : > { %1803 = vmatmul.mubr.msk.f32.gmra.mxu1 %vm511_vm1, %v460_v52 }
 0x117   : > { %1805 = vmatprep.mubr.msk.f32.mxu1 %vm511_vm1, %v461_v53 }
 0x11a   : > { %1806 = vmatmul.mubr.msk.f32.gmra.mxu1 %vm511_vm1, %v462_v54 }
 0x11b   : > { %1829 = vmatprep.mubr.msk.f32.mxu1 %vm511_vm1, %v689_v57 }
 0x1ce   : > { %v1798_v60 = vpop.f32.mrf.mxu1 }
 0x1cf   : > { %v2375_v18 = vadd.f32 %v1798_v60, %v479_v15  ;;  %v873_v60 = vld [vmem:[%s2579_s3] sm:$0xff]  ;;  %v878_v15 = vld [vmem:[%s2579_s3 + $0x28] sm:$0xff] }
 0x1d0   : > { %v602_v62 = vpop.f32.mrf.mxu1  ;;  %1834 = vmatprep.mubr.msk.f32.mxu0 %vm277_vm0, %v873_v60 }
 0x1d1   : > { %v2378_v24 = vadd.f32 %v602_v62, %v474_v22  ;;  %v650_v28 = vmin.f32 %v2375_v18, 0.0  ;;  %vm642_vm2 = vcmp.gt.f32.partialorder %v2375_v18, 0.0 }
 0x1d2   : > { %v1801_v0 = vpop.f32.mrf.mxu1 }
 0x1d3   : > { %v2371_v8 = vadd.f32 %v1801_v0, %v489_v2  ;;  %v649_v31 = vmin.f32 %v2378_v24, 0.0  ;;  %v659_v33 = vmul.f32 1.442695, %v650_v28  ;;  %vm641_vm3 = vcmp.gt.f32.partialorder %v2378_v24, 0.0  ;;  %v865_v0 = vpop.permute.xlu0 %864 }
 0x1d4   : > { %v612_v1 = vpop.f32.mrf.mxu1 }
 0x1d5   : > { %v2373_v12 = vadd.f32 %v612_v1, %v484_v5  ;;  %v652_v19 = vmin.f32 %v2371_v8, 0.0  ;;  %v657_v34 = vmul.f32 1.442695, %v649_v31  ;;  %vm644_vm14 = vcmp.gt.f32.partialorder %v2371_v8, 0.0 }
 0x1d6   : > { %v1804_v3 = vpop.f32.mrf.mxu1 }
 0x1d7   : > { %v628_v4 = vadd.f32 %v1804_v3, %v499_v61  ;;  %v651_v25 = vmin.f32 %v2373_v12, 0.0  ;;  %v663_v29 = vmul.f32 1.442695, %v652_v19  ;;  %vm643_vm15 = vcmp.gt.f32.partialorder %v2373_v12, 0.0  ;;  %v1812_v61 = vpop.f32.mrf.mxu0  ;;  %v927_v19 = vpop.permute.xlu0 %926 }
 0x1d8   : > { %v622_v7 = vpop.f32.mrf.mxu1 }
 0x1d9   : > { %v654_v9 = vmin.f32 %v628_v4, 0.0  ;;  %v623_v10 = vadd.f32 %v622_v7, %v494_v63  ;;  %v661_v32 = vmul.f32 1.442695, %v651_v25  ;;  %vm646_vm12 = vcmp.gt.f32.partialorder %v628_v4, 0.0 }
 0x1da   : > { %v1807_v11 = vpop.f32.mrf.mxu1 }
 0x1db   : > { %v653_v13 = vmin.f32 %v623_v10, 0.0  ;;  %v638_v14 = vadd.f32 %v1807_v11, %v509_v58  ;;  %v667_v16 = vmul.f32 1.442695, %v654_v9  ;;  %vm645_vm13 = vcmp.gt.f32.partialorder %v623_v10, 0.0  ;;  %v917_v22 = vpop.permute.xlu0 %916 }
 0x1dc   : > { %v632_v17 = vpop.f32.mrf.mxu1 }
 0x1dd   : > { %v656_v20 = vmin.f32 %v638_v14, 0.0  ;;  %v633_v21 = vadd.f32 %v632_v17, %v504_v59  ;;  %v665_v23 = vmul.f32 1.442695, %v653_v13  ;;  %1959 = vpow2.f32 %v667_v16  ;;  %v690_v59 = vld [vmem:[%s2577_s1 + $0x88] sm:$0xff]  ;;  %v875_v13 = vld [vmem:[%s2579_s3 + $0x10] sm:$0xff]  ;;  %v880_v17 = vld [vmem:[%s2579_s3 + $0x38] sm:$0xff] }
 0x1de   : > { %vm648_vm10 = vcmp.gt.f32.partialorder %v638_v14, 0.0  ;;  %v879_v16 = vld [vmem:[%s2579_s3 + $0x30] sm:$0xff] }
 0x1df   : > { %v671_v26 = vmul.f32 1.442695, %v656_v20  ;;  %v655_v27 = vmin.f32 %v633_v21, 0.0  ;;  %vm647_vm11 = vcmp.gt.f32.partialorder %v633_v21, 0.0 }
 0x1e1   : > { %1961 = vpow2.f32 %v671_v26  ;;  %v669_v30 = vmul.f32 1.442695, %v655_v27  ;;  %v907_v27 = vpop.permute.xlu0 %906 }
 0x1e2   : > { %1963 = vpow2.f32 %v665_v23 }
 0x1e3   : > { %1965 = vpow2.f32 %v669_v30 }
 0x1e4   : > { %1967 = vpow2.f32 %v663_v29 }
 0x1e5   : > { %1969 = vpow2.f32 %v661_v32 }
 0x1e6   : > { %1971 = vpow2.f32 %v659_v33 }
 0x1e7   : > { %1973 = vpow2.f32 %v657_v34 }
 0x1ea   : > { %v1960_v35 = vpop.eup %1959 }
 0x1eb   : > { %v1643_v42 = vadd.f32 -1.0, %v1960_v35 }
 0x1ed   : > { %v686_v47 = vsel %vm646_vm12, %v628_v4, %v1643_v42  ;;  %v765_v4 = vpop.f32.mrf.mxu0 }
 0x1ee   : > { %v1962_v36 = vpop.eup %1961 }
 0x1ef   : > { %v1964_v37 = vpop.eup %1963  ;;  %v1645_v38 = vadd.f32 -1.0, %v1962_v36 }
 0x1f0   : > { %v1966_v39 = vpop.eup %1965  ;;  %v1642_v45 = vadd.f32 -1.0, %v1964_v37 }
 0x1f1   : > { %v688_v40 = vsel %vm648_vm10, %v638_v14, %v1645_v38  ;;  %v1644_v41 = vadd.f32 -1.0, %v1966_v39  ;;  %v1968_v43 = vpop.eup %1967  ;;  %v877_v14 = vld [vmem:[%s2579_s3 + $0x20] sm:$0xff]  ;;  %v897_v39 = vpop.permute.xlu0 %896 }
 0x1f2   : > { %1813 = vmatprep.subr.mxu1 %v688_v40  ;;  %v1970_v46 = vpop.eup %1969  ;;  %v1641_v48 = vadd.f32 -1.0, %v1968_v43  ;;  %v685_v50 = vsel %vm645_vm13, %v623_v10, %v1642_v45 }
 0x1f3   : > { %1814 = vmatpush3.msra.mxu1 %v688_v40  ;;  %v687_v44 = vsel %vm647_vm11, %v633_v21, %v1644_v41  ;;  %v1972_v49 = vpop.eup %1971  ;;  %v1640_v51 = vadd.f32 -1.0, %v1970_v46 }
 0x1f4   : > { %1815 = vmatprep.subr.mxu1 %v687_v44  ;;  %v1974_v52 = vpop.eup %1973  ;;  %v684_v53 = vsel %vm644_vm14, %v2371_v8, %v1641_v48  ;;  %v1639_v54 = vadd.f32 -1.0, %v1972_v49  ;;  %v860_v8 = vpop.permute.xlu1 %859 }
 0x1f5   : > { %1816 = vmatpush3.msra.mxu1 %v687_v44  ;;  %v683_v55 = vsel %vm643_vm15, %v2373_v12, %v1640_v51  ;;  %v1638_v56 = vadd.f32 -1.0, %v1974_v52  ;;  %v874_v12 = vld [vmem:[%s2579_s3 + $0x8] sm:$0xff] }
 0x1f6   : > { %1817 = vmatprep.subr.mxu1 %v686_v47  ;;  %v682_v57 = vsel %vm642_vm2, %v2375_v18, %v1639_v54  ;;  %v1106_v18 = vld [vmem:[%s2579_s3 + $0x40] sm:$0xff] }
 0x1f7   : > { %1818 = vmatpush3.msra.mxu1 %v686_v47  ;;  %v681_v58 = vsel %vm641_vm3, %v2378_v24, %v1638_v56 }
 0x1f8   : > { %1819 = vmatprep.subr.mxu1 %v685_v50  ;;  %v922_v20 = vpop.permute.xlu1 %921 }
 0x1f9   : > { %1820 = vmatpush3.msra.mxu1 %v685_v50 }
 0x1fa   : > { %1821 = vmatprep.subr.mxu1 %v684_v53 }
 0x1fb   : > { %1822 = vmatpush3.msra.mxu1 %v684_v53 }
 0x1fc   : > { %1823 = vmatprep.subr.mxu1 %v683_v55  ;;  %v912_v24 = vpop.permute.xlu1 %911 }
 0x1fd   : > { %1824 = vmatpush3.msra.mxu1 %v683_v55 }
 0x1fe   : > { %1825 = vmatprep.subr.mxu1 %v682_v57 }
 0x1ff   : > { %1826 = vmatpush3.msra.mxu1 %v682_v57 }
 0x200   : > { %1827 = vmatprep.subr.mxu1 %v681_v58  ;;  %v902_v30 = vpop.permute.xlu1 %901 }
 0x201   : > { %1828 = vmatpush3.msra.mxu1 %v681_v58 }
 0x202   : > { %1830 = vmatmul.mubr.msk.f32.vlgmr.msra.gmra.mxu1 %vm511_vm1, %v690_v59 }
 0x204   : > { %v892_v46 = vpop.permute.xlu1 %891 }
 0x2c2   : > { %v1831_v62 = vpop.f32.mrf.mxu1 }
 0x2c3   : > { %v852_v63 = vadd.f32 %v1831_v62, %v1812_v61 }
 0x2c4   : > { %v846_v3 = vpop.f32.mrf.mxu1 }
 0x2c5   : > { %v2399_v1 = vadd.f32 %v865_v0, %v852_v63  ;;  %v847_v5 = vadd.f32 %v846_v3, %v765_v4 }
 0x2c7   : > { %v869_v2 = vmul.f32 1.442695, %v2399_v1  ;;  %v867_v9 = vadd.f32 %v860_v8, %v847_v5 }
 0x2c9   : > { %1975 = vpow2.f32 %v869_v2 }
 0x2d6   : > { %v1976_v7 = vpop.eup %1975 }
 0x2d7   : > { %v871_v10 = vmul.f32 %v1976_v7, %v2177_v6  ;;  %v876_v6 = vld [vmem:[%s2579_s3 + $0x18] sm:$0xff] }
 0x2d9   : > { %v2403_v11 = vadd.f32 %v871_v10, %v867_v9 }
 0x2db   : > { %1832 = vmatprep.subr.mxu0 %v2403_v11  ;;  %1874 = vmatprep.subr.mxu1 %v2403_v11 }
 0x2dc   : > { %1833 = vmatpush3.msra.mxu0 %v2403_v11  ;;  %1875 = vmatpush3.msra.mxu1 %v2403_v11 }
 0x2dd   : > { %1835 = vmatmul.mubr.msk.f32.vlgmr.msra.gmra.mxu0 %vm277_vm0, %v874_v12 }
 0x2de   : > { %1837 = vmatprep.mubr.msk.f32.mxu0 %vm277_vm0, %v875_v13 }
 0x2e1   : > { %1838 = vmatmul.mubr.msk.f32.gmra.mxu0 %vm277_vm0, %v876_v6 }
 0x2e2   : > { %1840 = vmatprep.mubr.msk.f32.mxu0 %vm277_vm0, %v877_v14 }
 0x2e5   : > { %1841 = vmatmul.mubr.msk.f32.gmra.mxu0 %vm277_vm0, %v878_v15 }
 0x2e6   : > { %1843 = vmatprep.mubr.msk.f32.mxu0 %vm277_vm0, %v879_v16 }
 0x2e9   : > { %1844 = vmatmul.mubr.msk.f32.gmra.mxu0 %vm277_vm0, %v880_v17 }
 0x2ea   : > { %1862 = vmatprep.mubr.msk.f32.mxu0 %vm511_vm1, %v1106_v18 }
 0x39d   : > { %v1836_v21 = vpop.f32.mrf.mxu0 }
 0x39e   : > { %v2445_v42 = vadd.f32 %v1836_v21, %v897_v39  ;;  %v1107_v21 = vld [vmem:[%s2579_s3 + $0x48] sm:$0xff] }
 0x39f   : > { %v1019_v23 = vpop.f32.mrf.mxu0 }
 0x3a0   : > { %v2448_v48 = vadd.f32 %v1019_v23, %v892_v46  ;;  %v1067_v52 = vmin.f32 %v2445_v42, 0.0  ;;  %vm1059_vm10 = vcmp.gt.f32.partialorder %v2445_v42, 0.0  ;;  %v1109_v23 = vld [vmem:[%s2579_s3 + $0x58] sm:$0xff] }
 0x3a1   : > { %v1839_v25 = vpop.f32.mrf.mxu0 }
 0x3a2   : > { %v2441_v32 = vadd.f32 %v1839_v25, %v907_v27  ;;  %v1066_v55 = vmin.f32 %v2448_v48, 0.0  ;;  %v1076_v57 = vmul.f32 1.442695, %v1067_v52  ;;  %vm1058_vm11 = vcmp.gt.f32.partialorder %v2448_v48, 0.0  ;;  %v1111_v25 = vld [vmem:[%s2579_s3 + $0x68] sm:$0xff]  ;;  %v1113_v27 = vld [vmem:[%s2579_s3 + $0x78] sm:$0xff] }
 0x3a3   : > { %v1029_v26 = vpop.f32.mrf.mxu0 }
 0x3a4   : > { %v2443_v36 = vadd.f32 %v1029_v26, %v902_v30  ;;  %v1069_v43 = vmin.f32 %v2441_v32, 0.0  ;;  %v1074_v58 = vmul.f32 1.442695, %v1066_v55  ;;  %vm1061_vm8 = vcmp.gt.f32.partialorder %v2441_v32, 0.0  ;;  %v1112_v26 = vld [vmem:[%s2579_s3 + $0x70] sm:$0xff]  ;;  %v1339_v30 = vld [vmem:[%s2579_s3 + $0x80] sm:$0xff] }
 0x3a5   : > { %v1842_v28 = vpop.f32.mrf.mxu0 }
 0x3a6   : > { %v1045_v29 = vadd.f32 %v1842_v28, %v917_v22  ;;  %v1068_v49 = vmin.f32 %v2443_v36, 0.0  ;;  %v1080_v53 = vmul.f32 1.442695, %v1069_v43  ;;  %vm1060_vm9 = vcmp.gt.f32.partialorder %v2443_v36, 0.0  ;;  %v1108_v22 = vld [vmem:[%s2579_s3 + $0x50] sm:$0xff] }
 0x3a7   : > { %v1039_v31 = vpop.f32.mrf.mxu0  ;;  %v1341_v28 = vld [vmem:[%s2579_s3 + $0x90] sm:$0xff] }
 0x3a8   : > { %v1071_v33 = vmin.f32 %v1045_v29, 0.0  ;;  %v1040_v34 = vadd.f32 %v1039_v31, %v912_v24  ;;  %v1078_v56 = vmul.f32 1.442695, %v1068_v49  ;;  %vm1063_vm6 = vcmp.gt.f32.partialorder %v1045_v29, 0.0  ;;  %v1110_v24 = vld [vmem:[%s2579_s3 + $0x60] sm:$0xff]  ;;  %1876 = vmatprep.mubr.msk.f32.mxu1 %vm277_vm0, %v1341_v28  ;;  %v1160_v31 = vpop.permute.xlu0 %1159 }
 0x3a9   : > { %v1845_v35 = vpop.f32.mrf.mxu0 }
 0x3aa   : > { %v1070_v37 = vmin.f32 %v1040_v34, 0.0  ;;  %v1055_v38 = vadd.f32 %v1845_v35, %v927_v19  ;;  %v1084_v40 = vmul.f32 1.442695, %v1071_v33  ;;  %vm1062_vm7 = vcmp.gt.f32.partialorder %v1040_v34, 0.0 }
 0x3ab   : > { %v1049_v41 = vpop.f32.mrf.mxu0 }
 0x3ac   : > { %v1073_v44 = vmin.f32 %v1055_v38, 0.0  ;;  %v1050_v45 = vadd.f32 %v1049_v41, %v922_v20  ;;  %v1082_v47 = vmul.f32 1.442695, %v1070_v37  ;;  %1977 = vpow2.f32 %v1084_v40 }
 0x3ad   : > { %vm1065_vm4 = vcmp.gt.f32.partialorder %v1055_v38, 0.0 }
 0x3ae   : > { %v1088_v50 = vmul.f32 1.442695, %v1073_v44  ;;  %v1072_v51 = vmin.f32 %v1050_v45, 0.0  ;;  %vm1064_vm5 = vcmp.gt.f32.partialorder %v1050_v45, 0.0 }
 0x3b0   : > { %1979 = vpow2.f32 %v1088_v50  ;;  %v1086_v54 = vmul.f32 1.442695, %v1072_v51 }
 0x3b1   : > { %1981 = vpow2.f32 %v1082_v47 }
 0x3b2   : > { %1983 = vpow2.f32 %v1086_v54 }
 0x3b3   : > { %1985 = vpow2.f32 %v1080_v53 }
 0x3b4   : > { %1987 = vpow2.f32 %v1078_v56 }
 0x3b5   : > { %1989 = vpow2.f32 %v1076_v57 }
 0x3b6   : > { %1991 = vpow2.f32 %v1074_v58 }
 0x3b9   : > { %v1978_v59 = vpop.eup %1977 }
 0x3ba   : > { %v1663_v3 = vadd.f32 -1.0, %v1978_v59 }
 0x3bc   : > { %v1103_v9 = vsel %vm1063_vm6, %v1045_v29, %v1663_v3  ;;  %v1342_v29 = vld [vmem:[%s2579_s3 + $0x98] sm:$0xff] }
 0x3bd   : > { %v1980_v60 = vpop.eup %1979  ;;  %1877 = vmatmul.mubr.msk.f32.vlgmr.msra.gmra.mxu1 %vm277_vm0, %v1342_v29 }
 0x3be   : > { %v1982_v61 = vpop.eup %1981  ;;  %v1665_v62 = vadd.f32 -1.0, %v1980_v60  ;;  %1895 = vmatprep.mubr.msk.f32.mxu1 %vm511_vm1, %v1339_v30 }
 0x3bf   : > { %v1984_v63 = vpop.eup %1983  ;;  %v1662_v7 = vadd.f32 -1.0, %v1982_v61 }
 0x3c0   : > { %v1105_v0 = vsel %vm1065_vm4, %v1055_v38, %v1665_v62  ;;  %v1664_v2 = vadd.f32 -1.0, %v1984_v63  ;;  %v1986_v4 = vpop.eup %1985 }
 0x3c1   : > { %1846 = vmatprep.subr.mxu0 %v1105_v0  ;;  %v1988_v8 = vpop.eup %1987  ;;  %v1661_v10 = vadd.f32 -1.0, %v1986_v4  ;;  %v1102_v13 = vsel %vm1062_vm7, %v1040_v34, %v1662_v7  ;;  %v1150_v34 = vpop.permute.xlu0 %1149 }
 0x3c2   : > { %1847 = vmatpush3.msra.mxu0 %v1105_v0  ;;  %v1104_v5 = vsel %vm1064_vm5, %v1050_v45, %v1664_v2  ;;  %v1990_v12 = vpop.eup %1989  ;;  %v1660_v6 = vadd.f32 -1.0, %v1988_v8 }
 0x3c3   : > { %1848 = vmatprep.subr.mxu0 %v1104_v5  ;;  %v1992_v14 = vpop.eup %1991  ;;  %v1101_v15 = vsel %vm1061_vm8, %v2441_v32, %v1661_v10  ;;  %v1659_v16 = vadd.f32 -1.0, %v1990_v12  ;;  %v1155_v32 = vpop.permute.xlu1 %1154 }
 0x3c4   : > { %1849 = vmatpush3.msra.mxu0 %v1104_v5  ;;  %v1100_v17 = vsel %vm1060_vm9, %v2443_v36, %v1660_v6  ;;  %v1658_v18 = vadd.f32 -1.0, %v1992_v14 }
 0x3c5   : > { %1850 = vmatprep.subr.mxu0 %v1103_v9  ;;  %v1099_v19 = vsel %vm1059_vm10, %v2445_v42, %v1659_v16  ;;  %v1140_v39 = vpop.permute.xlu0 %1139 }
 0x3c6   : > { %1851 = vmatpush3.msra.mxu0 %v1103_v9  ;;  %v1098_v20 = vsel %vm1058_vm11, %v2448_v48, %v1658_v18 }
 0x3c7   : > { %1852 = vmatprep.subr.mxu0 %v1102_v13  ;;  %v1145_v36 = vpop.permute.xlu1 %1144 }
 0x3c8   : > { %1853 = vmatpush3.msra.mxu0 %v1102_v13 }
 0x3c9   : > { %1854 = vmatprep.subr.mxu0 %v1101_v15  ;;  %v1130_v51 = vpop.permute.xlu0 %1129 }
 0x3ca   : > { %1855 = vmatpush3.msra.mxu0 %v1101_v15 }
 0x3cb   : > { %1856 = vmatprep.subr.mxu0 %v1100_v17  ;;  %v1135_v42 = vpop.permute.xlu1 %1134 }
 0x3cc   : > { %1857 = vmatpush3.msra.mxu0 %v1100_v17 }
 0x3cd   : > { %1858 = vmatprep.subr.mxu0 %v1099_v19 }
 0x3ce   : > { %1859 = vmatpush3.msra.mxu0 %v1099_v19 }
 0x3cf   : > { %1860 = vmatprep.subr.mxu0 %v1098_v20  ;;  %v1125_v58 = vpop.permute.xlu1 %1124 }
 0x3d0   : > { %1861 = vmatpush3.msra.mxu0 %v1098_v20 }
 0x3d1   : > { %1863 = vmatmul.mubr.msk.f32.vlgmr.msra.gmra.mxu0 %vm511_vm1, %v1107_v21 }
 0x3d2   : > { %1865 = vmatprep.mubr.msk.f32.mxu0 %vm511_vm1, %v1108_v22 }
 0x3d5   : > { %1866 = vmatmul.mubr.msk.f32.gmra.mxu0 %vm511_vm1, %v1109_v23 }
 0x3d6   : > { %1868 = vmatprep.mubr.msk.f32.mxu0 %vm511_vm1, %v1110_v24 }
 0x3d9   : > { %1869 = vmatmul.mubr.msk.f32.gmra.mxu0 %vm511_vm1, %v1111_v25 }
 0x3da   : > { %1871 = vmatprep.mubr.msk.f32.mxu0 %vm511_vm1, %v1112_v26 }
 0x3dd   : > { %1872 = vmatmul.mubr.msk.f32.gmra.mxu0 %vm511_vm1, %v1113_v27 }
 0x491   : > { %v1864_v33 = vpop.f32.mrf.mxu0 }
 0x492   : > { %v2505_v54 = vadd.f32 %v1864_v33, %v1130_v51  ;;  %v1340_v33 = vld [vmem:[%s2579_s3 + $0x88] sm:$0xff] }
 0x493   : > { %v1252_v35 = vpop.f32.mrf.mxu0 }
 0x494   : > { %v2508_v60 = vadd.f32 %v1252_v35, %v1125_v58  ;;  %v1300_v0 = vmin.f32 %v2505_v54, 0.0  ;;  %vm1292_vm3 = vcmp.gt.f32.partialorder %v2505_v54, 0.0 }
 0x495   : > { %v1867_v37 = vpop.f32.mrf.mxu0 }
 0x496   : > { %v2501_v44 = vadd.f32 %v1867_v37, %v1140_v39  ;;  %v1299_v4 = vmin.f32 %v2508_v60, 0.0  ;;  %v1309_v7 = vmul.f32 1.442695, %v1300_v0  ;;  %vm1291_vm4 = vcmp.gt.f32.partialorder %v2508_v60, 0.0 }
 0x497   : > { %v1262_v38 = vpop.f32.mrf.mxu0 }
 0x498   : > { %v2503_v48 = vadd.f32 %v1262_v38, %v1135_v42  ;;  %v1302_v55 = vmin.f32 %v2501_v44, 0.0  ;;  %v1307_v8 = vmul.f32 1.442695, %v1299_v4  ;;  %vm1294_vm15 = vcmp.gt.f32.partialorder %v2501_v44, 0.0  ;;  %v1515_v38 = vpop.permute.xlu0 %1514 }
 0x499   : > { %v1870_v40 = vpop.f32.mrf.mxu0 }
 0x49a   : > { %v1278_v41 = vadd.f32 %v1870_v40, %v1150_v34  ;;  %v1301_v61 = vmin.f32 %v2503_v48, 0.0  ;;  %v1313_v2 = vmul.f32 1.442695, %v1302_v55  ;;  %vm1293_vm2 = vcmp.gt.f32.partialorder %v2503_v48, 0.0  ;;  %v1878_v34 = vpop.f32.mrf.mxu1 }
 0x49b   : > { %v1272_v43 = vpop.f32.mrf.mxu0 }
 0x49c   : > { %v1304_v45 = vmin.f32 %v1278_v41, 0.0  ;;  %v1273_v46 = vadd.f32 %v1272_v43, %v1145_v36  ;;  %v1311_v5 = vmul.f32 1.442695, %v1301_v61  ;;  %vm1296_vm13 = vcmp.gt.f32.partialorder %v1278_v41, 0.0  ;;  %v1415_v35 = vpop.f32.mrf.mxu1 }
 0x49d   : > { %v1873_v47 = vpop.f32.mrf.mxu0 }
 0x49e   : > { %v1303_v49 = vmin.f32 %v1273_v46, 0.0  ;;  %v1288_v50 = vadd.f32 %v1873_v47, %v1160_v31  ;;  %v1317_v52 = vmul.f32 1.442695, %v1304_v45  ;;  %vm1295_vm14 = vcmp.gt.f32.partialorder %v1273_v46, 0.0 }
 0x49f   : > { %v1282_v53 = vpop.f32.mrf.mxu0 }
 0x4a0   : > { %v1306_v56 = vmin.f32 %v1288_v50, 0.0  ;;  %v1283_v57 = vadd.f32 %v1282_v53, %v1155_v32  ;;  %v1315_v59 = vmul.f32 1.442695, %v1303_v49  ;;  %1993 = vpow2.f32 %v1317_v52  ;;  %v1510_v52 = vpop.permute.xlu1 %1509 }
 0x4a1   : > { %vm1298_vm0 = vcmp.gt.f32.partialorder %v1288_v50, 0.0 }
 0x4a2   : > { %v1321_v62 = vmul.f32 1.442695, %v1306_v56  ;;  %v1305_v63 = vmin.f32 %v1283_v57, 0.0  ;;  %vm1297_vm12 = vcmp.gt.f32.partialorder %v1283_v57, 0.0 }
 0x4a4   : > { %1995 = vpow2.f32 %v1321_v62  ;;  %v1319_v3 = vmul.f32 1.442695, %v1305_v63 }
 0x4a5   : > { %1997 = vpow2.f32 %v1315_v59 }
 0x4a6   : > { %1999 = vpow2.f32 %v1319_v3 }
 0x4a7   : > { %2001 = vpow2.f32 %v1313_v2 }
 0x4a8   : > { %2003 = vpow2.f32 %v1311_v5 }
 0x4a9   : > { %2005 = vpow2.f32 %v1309_v7 }
 0x4aa   : > { %2007 = vpow2.f32 %v1307_v8 }
 0x4ad   : > { %v1994_v9 = vpop.eup %1993 }
 0x4ae   : > { %v1679_v16 = vadd.f32 -1.0, %v1994_v9 }
 0x4b0   : > { %v1336_v21 = vsel %vm1296_vm13, %v1278_v41, %v1679_v16 }
 0x4b1   : > { %v1996_v10 = vpop.eup %1995 }
 0x4b2   : > { %v1998_v12 = vpop.eup %1997  ;;  %v1681_v13 = vadd.f32 -1.0, %v1996_v10 }
 0x4b3   : > { %v2000_v6 = vpop.eup %1999  ;;  %v1678_v19 = vadd.f32 -1.0, %v1998_v12 }
 0x4b4   : > { %v1338_v14 = vsel %vm1298_vm0, %v1288_v50, %v1681_v13  ;;  %v1680_v15 = vadd.f32 -1.0, %v2000_v6  ;;  %v2002_v17 = vpop.eup %2001 }
 0x4b5   : > { %1879 = vmatprep.subr.mxu1 %v1338_v14  ;;  %v2004_v20 = vpop.eup %2003  ;;  %v1677_v22 = vadd.f32 -1.0, %v2002_v17  ;;  %v1335_v24 = vsel %vm1295_vm14, %v1273_v46, %v1678_v19 }
 0x4b6   : > { %1880 = vmatpush3.msra.mxu1 %v1338_v14  ;;  %v1337_v18 = vsel %vm1297_vm12, %v1283_v57, %v1680_v15  ;;  %v2006_v23 = vpop.eup %2005  ;;  %v1676_v25 = vadd.f32 -1.0, %v2004_v20 }
 0x4b7   : > { %1881 = vmatprep.subr.mxu1 %v1337_v18  ;;  %v2008_v26 = vpop.eup %2007  ;;  %v1334_v27 = vsel %vm1294_vm15, %v2501_v44, %v1677_v22  ;;  %v1675_v28 = vadd.f32 -1.0, %v2006_v23 }
 0x4b8   : > { %1882 = vmatpush3.msra.mxu1 %v1337_v18  ;;  %v1333_v29 = vsel %vm1293_vm2, %v2503_v48, %v1676_v25  ;;  %v1674_v30 = vadd.f32 -1.0, %v2008_v26 }
 0x4b9   : > { %1883 = vmatprep.subr.mxu1 %v1336_v21  ;;  %v1332_v31 = vsel %vm1292_vm3, %v2505_v54, %v1675_v28 }
 0x4ba   : > { %1884 = vmatpush3.msra.mxu1 %v1336_v21  ;;  %v1331_v32 = vsel %vm1291_vm4, %v2508_v60, %v1674_v30 }
 0x4bb   : > { %1885 = vmatprep.subr.mxu1 %v1335_v24 }
 0x4bc   : > { %1886 = vmatpush3.msra.mxu1 %v1335_v24 }
 0x4bd   : > { %1887 = vmatprep.subr.mxu1 %v1334_v27 }
 0x4be   : > { %1888 = vmatpush3.msra.mxu1 %v1334_v27 }
 0x4bf   : > { %1889 = vmatprep.subr.mxu1 %v1333_v29 }
 0x4c0   : > { %1890 = vmatpush3.msra.mxu1 %v1333_v29 }
 0x4c1   : > { %1891 = vmatprep.subr.mxu1 %v1332_v31 }
 0x4c2   : > { %1892 = vmatpush3.msra.mxu1 %v1332_v31 }
 0x4c3   : > { %1893 = vmatprep.subr.mxu1 %v1331_v32 }
 0x4c4   : > { %1894 = vmatpush3.msra.mxu1 %v1331_v32 }
 0x4c5   : > { %1896 = vmatmul.mubr.msk.f32.vlgmr.msra.gmra.mxu1 %vm511_vm1, %v1340_v33 }
 0x585   : > { %v1897_v36 = vpop.f32.mrf.mxu1 }
 0x586   : > { %v1502_v37 = vadd.f32 %v1897_v36, %v1878_v34 }
 0x587   : > { %v1496_v46 = vpop.f32.mrf.mxu1 }
 0x588   : > { %v1518_v39 = vadd.f32 %v1515_v38, %v1502_v37  ;;  %v1497_v49 = vadd.f32 %v1496_v46, %v1415_v35 }
 0x58a   : > { %v1519_v40 = vmul.f32 1.442695, %v1518_v39  ;;  %v1523_v41 = vadd.f32 %v1518_v39, %v2399_v1  ;;  %v1517_v53 = vadd.f32 %v1510_v52, %v1497_v49 }
 0x58c   : > { %2009 = vpow2.f32 %v1519_v40  ;;  %v1524_v42 = vrot.slane %v1523_v41, 4 }
 0x58e   : > { %v1525_v43 = vadd.f32 %v1524_v42, %v1523_v41 }
 0x590   : > { %v1526_v44 = vrot.slane %v1525_v43, 2 }
 0x592   : > { %v1527_v45 = vadd.f32 %v1526_v44, %v1525_v43 }
 0x594   : > { %v1528_v47 = vrot.slane %v1527_v45, 1 }
 0x596   : > { %v1529_v48 = vadd.f32 %v1528_v47, %v1527_v45 }
 0x598   : > { %v1530_v50 = vsub.f32 0.0, %v1529_v48 }
 0x599   : > { %v2010_v51 = vpop.eup %2009 }
 0x59a   : > { %v1521_v1 = vmul.f32 %v2010_v51, %v2403_v11  ;;  %1532 = vst [vmem:[%s215_s26 + $0x8] sm:$0x1] %v1530_v50 }
 0x59c   : > { %v1522_v54 = vadd.f32 %v1521_v1, %v1517_v53 }
 0x59e   : > { %1531 = vst [vmem:[%s215_s26] sm:$0xff] %v1522_v54 }
 0x59f   : > { %2024 = shalt.err (!%p2021_p3)
}
 0x5a0   : > { %s2025_s14 = scalar_lea.hbm %s2534_s9, 256  ;;  %s2029_s17 = scalar_lea.hbm %s2581_s5, 512 }
 0x5a1   : > { %p2026_p4 = scmp.ne.s32.totalorder %s2534_s9, %s2025_s14  ;;  %p2030_p9 = scmp.lt.s32.totalorder %s2534_s9, %s2581_s5 }
 0x5a2   : > { %p2031_p10 = scmp.lt.s32.totalorder %s2029_s17, %s2025_s14 }
 0x5a3   : > { %p2027_p7 = pnand %p2026_p4, %p2146_p5 }
 0x5a4   : > { %p2032_p11 = por %p2031_p10, %p2030_p9 }
 0x5a5   : > { %p2028_p8 = pneg %p2027_p7 }
 0x5a7   : > { %p2033_p12 = pnand %p2032_p11, %p2028_p8 }
 0x5a9   : > { %2036 = shalt.err (!%p2033_p12)
}
 0x5aa   : > { %s2075_s26 = smov 128   ;;  %s2076_s6 = smov 256  }
 0x5ab   : > { %s2077_s7 = smov 8  }
 0x5ac   : > { %1898 = dma.vmem_to_hbm [thread:$0]  (%p2146_p5), %s2529_s30, 256, %s2534_s9, %s2536_s10, %s2075_s26, %s2076_s6, %s2077_s7  }
 0x5ad PF: > { %p1904_p13 = scmp.ge.s32.totalorder %s2071_s21, 2  ;;  %s1561_s8 = sand.u32 1, %s2059_s18  }
 0x5ae   : > { %s1562_s22 = scalar_lea.sflag [#allocation3], %s1561_s8 }
 0x5af   : > { %p1901_p0 = pnand %p1904_p13, %p2150_p6 }
 0x5b1   : > { %p1902_p1 = pneg %p1901_p0 }
 0x5b3   : > { %2054 = dma.done.wait (%p1902_p1), %s1562_s22, 256  }
 0x5b4   : > { %2056 = vsyncadd (%p1902_p1), %s1562_s22, 4294967040  ;;  %p15_p2 = scmp.ge.s32.totalorder %s2133_s24, 4   ;;  %s2584_s18 = smov %s2063_s19 }
 0x5b5   : > { %s2585_s19 = smov %s2067_s20  ;;  %s2586_s20 = smov %s2144_s27 }
 0x5b6   : > { %s2587_s21 = smov %s2133_s24  ;;  %17 = sbr.rel (!%p15_p2) target bundleno = 3 (0x3), region = 75 }
 0x5bb   :  { %1567 = vsyncpa [#allocation3], 1 }
 0x5bc   :  { %1569 = vsyncpa [#allocation3 + $0x1], 1 }

</bundles_post_ra>
